<compile_context>
chip_gen: v7x
topology: tpu7x:2x2x1
jax: 0.10.0
libtpu: 0.0.40
codegen_flags: <defaults>
</compile_context>

<pallas_src>
import jax
import jax.numpy as jnp
from jax.experimental import pallas as pl
from jax.experimental.pallas import tpu as pltpu

NEG_SLOPE = 0.01  # torch.nn.LeakyReLU default

D_IN = 32
D_H1 = 128
D_H2 = 256
D_OUT = 300
D_OUT_PAD = 384  # 300 padded up to a multiple of 128 for a lane-dense store


def _round_up(n, m):
    return ((n + m - 1) // m) * m


def _leaky_relu(v):
    return jnp.where(v >= 0, v, NEG_SLOPE * v)


def decoder_kernel(x_ref, w1_ref, b1_ref, w2_ref, b2_ref, w3_ref, b3_ref, o_ref):
    # x and all weights arrive pre-cast to bf16; biases are f32.
    # MXU matmuls accumulate in f32; epilogues (bias + LeakyReLU) stay f32.

    # Layer 1: [TB,32] @ [32,128] + [1,128]
    h1 = jnp.dot(x_ref[...], w1_ref[...], preferred_element_type=jnp.float32)
    h1 = _leaky_relu(h1 + b1_ref[...])

    # Layer 2: [TB,128] @ [128,256] + [1,256]
    h2 = jnp.dot(h1.astype(jnp.bfloat16), w2_ref[...],
                 preferred_element_type=jnp.float32)
    h2 = _leaky_relu(h2 + b2_ref[...])

    # Layer 3: [TB,256] @ [256,384(pad of 300)] + [1,384]
    h3 = jnp.dot(h2.astype(jnp.bfloat16), w3_ref[...],
                 preferred_element_type=jnp.float32)
    o_ref[...] = _leaky_relu(h3 + b3_ref[...]).astype(o_ref.dtype)


def decoder_forward(x, params, *, tb=512, out_dtype=jnp.float32,
                    keep_padded=False):
    """x: [B, 32] (any float dtype; cast to bf16 once here).

    Returns [B, 300] in `out_dtype` (or the padded [B_pad, 384] slab when
    keep_padded=True; rows >= B and columns 300..383 are padding and exactly 0
    in the column direction).
    """
    w1, b1 = params["w1"], params["b1"]          # bf16, f32
    w2, b2 = params["w2"], params["b2"]          # bf16, f32
    w3p, b3p = params["w3p"], params["b3p"]      # bf16 (padded), f32 (padded)

    B = x.shape[0]

    # Tile choice:
    #  * balance tiles over the batch instead of padding to a fixed TB
    #  * >=2 grid steps when B is big enough so v7x's 2nd TensorCore is used
    #  * multiple of 16 (bf16 sublane packing)
    n_tiles = max(pl.cdiv(B, tb), 2 if B >= 32 else 1)
    TB = _round_up(pl.cdiv(B, n_tiles), 16)
    B_pad = _round_up(B, TB)
    grid = (B_pad // TB,)

    xb = x.astype(jnp.bfloat16)
    if B_pad != B:
        xb = jnp.pad(xb, ((0, B_pad - B), (0, 0)))

    # Weights/biases: full-array blocks with constant index_map -> stay
    # resident in VMEM across grid steps (no re-DMA).
    resident = lambda arr: pl.BlockSpec(arr.shape, lambda i: (0, 0))

    out_itemsize = jnp.dtype(out_dtype).itemsize
    weight_bytes = sum(int(a.size) * a.dtype.itemsize
                       for a in (w1, b1, w2, b2, w3p, b3p))
    flops = 2 * B_pad * (D_IN * D_H1 + D_H1 * D_H2 + D_H2 * D_OUT_PAD)
    bytes_accessed = (B_pad * D_IN * xb.dtype.itemsize
                      + B_pad * D_OUT_PAD * out_itemsize
                      + weight_bytes)
    cost = pl.CostEstimate(flops=flops, transcendentals=0,
                           bytes_accessed=bytes_accessed)

    out_padded = pl.pallas_call(
        decoder_kernel,
        out_shape=jax.ShapeDtypeStruct((B_pad, D_OUT_PAD), out_dtype),
        grid=grid,
        in_specs=[
            pl.BlockSpec((TB, D_IN), lambda i: (i, 0)),   # x tile (bf16)
            resident(w1), resident(b1),
            resident(w2), resident(b2),
            resident(w3p), resident(b3p),
        ],
        out_specs=pl.BlockSpec((TB, D_OUT_PAD), lambda i: (i, 0)),
        compiler_params=pltpu.CompilerParams(
            dimension_semantics=("parallel",)),  # megacore-shardable on v7x
        cost_estimate=cost,
    )(xb, w1, b1, w2, b2, w3p, b3p)

    if keep_padded:
        return out_padded
    out = out_padded if B_pad == B else out_padded[:B]
    return out[:, :D_OUT]


def init_params(key):
    """Deterministic init mimicking nn.Linear shapes.
    PyTorch Linear stores W as [out, in]; we pre-transpose to [in, out].
    Kernel weights are pre-cast to bf16 once here; biases stay f32.
    f32 originals are kept only for the reference path."""
    def linear(key, d_in, d_out):
        kw, kb = jax.random.split(key)
        bound = 1.0 / jnp.sqrt(d_in)
        w = jax.random.uniform(kw, (d_in, d_out), jnp.float32, -bound, bound)
        b = jax.random.uniform(kb, (1, d_out), jnp.float32, -bound, bound)
        return w, b

    k1, k2, k3 = jax.random.split(key, 3)
    w1, b1 = linear(k1, D_IN, D_H1)
    w2, b2 = linear(k2, D_H1, D_H2)
    w3, b3 = linear(k3, D_H2, D_OUT)

    # Pad layer-3 output dim 300 -> 384 (multiple of 128) with zeros so the
    # kernel output is lane-dense (unmasked vst); padded columns stay exactly
    # 0 through LeakyReLU.
    w3p = jnp.zeros((D_H2, D_OUT_PAD), jnp.float32).at[:, :D_OUT].set(w3)
    b3p = jnp.zeros((1, D_OUT_PAD), jnp.float32).at[:, :D_OUT].set(b3)

    return {
        # kernel params (bf16 weights, f32 biases)
        "w1": w1.astype(jnp.bfloat16), "b1": b1,
        "w2": w2.astype(jnp.bfloat16), "b2": b2,
        "w3p": w3p.astype(jnp.bfloat16), "b3p": b3p,
        # f32 originals for the reference
        "w1_f32": w1, "w2_f32": w2, "w3_f32": w3, "b3": b3,
    }


def decoder_reference(x, params):
    # TODO(synk): f32-exact parity with nn.Linear requires an f32 MXU path;
    # the kernel intentionally uses bf16 matmul inputs with f32 accumulation.
    h = _leaky_relu(x @ params["w1_f32"] + params["b1"])
    h = _leaky_relu(h @ params["w2_f32"] + params["b2"])
    h = _leaky_relu(h @ params["w3_f32"] + params["b3"])
    return h


if __name__ == "__main__":
    key = jax.random.PRNGKey(0)
    kx, kp = jax.random.split(key)
    B = 8
    x = jax.random.normal(kx, (B, D_IN), jnp.float32)
    params = init_params(kp)

    out = jax.block_until_ready(decoder_forward(x, params))
    ref = decoder_reference(x, params)
    assert out.shape == (B, D_OUT), out.shape
    # bf16 matmul inputs with f32 accumulation -> relaxed tolerance vs f32 ref.
    assert jnp.allclose(out, ref, atol=5e-2, rtol=5e-2), "mismatch vs reference"

    # Batch needing padding + multiple (balanced) grid steps.
    B2 = 300
    x2 = jax.random.normal(jax.random.PRNGKey(1), (B2, D_IN), jnp.float32)
    out2 = jax.block_until_ready(decoder_forward(x2, params, tb=128))
    ref2 = decoder_reference(x2, params)
    assert out2.shape == (B2, D_OUT), out2.shape
    assert jnp.allclose(out2, ref2, atol=5e-2, rtol=5e-2), "mismatch (tiled batch)"

    # bf16 output path (halves the dominant writeback HBM term).
    out3 = jax.block_until_ready(
        decoder_forward(x2, params, out_dtype=jnp.bfloat16))
    assert out3.shape == (B2, D_OUT) and out3.dtype == jnp.bfloat16
    assert jnp.allclose(out3.astype(jnp.float32), ref2, atol=1e-1, rtol=1e-1), \
        "mismatch (bf16 output)"

    print("KERNEL_OK")
</pallas_src>

<mosaic_0001>
module attributes {stable_mosaic.version = 11 : i64} {
  func.func @decoder_kernel(%arg0: i32, %arg1: memref<16x32xbf16, #tpu.memory_space<vmem>>, %arg2: memref<32x128xbf16, #tpu.memory_space<vmem>>, %arg3: memref<1x128xf32, #tpu.memory_space<vmem>>, %arg4: memref<128x256xbf16, #tpu.memory_space<vmem>>, %arg5: memref<1x256xf32, #tpu.memory_space<vmem>>, %arg6: memref<256x384xbf16, #tpu.memory_space<vmem>>, %arg7: memref<1x384xf32, #tpu.memory_space<vmem>>, %arg8: memref<16x384xf32, #tpu.memory_space<vmem>>) attributes {dimension_semantics = [#tpu.dimension_semantics<parallel>], iteration_bounds = array<i64: 1>, scalar_prefetch = 0 : i64, scratch_operands = 0 : i64, tpu.core_type = #tpu.core_type<tc>, window_params = [{transform_indices = @transform_0, window_bounds = array<i64: 16, 32>}, {pipeline_mode = #tpu.pipeline_mode<synchronous>, transform_indices = @transform_1, window_bounds = array<i64: 32, 128>}, {pipeline_mode = #tpu.pipeline_mode<synchronous>, transform_indices = @transform_2, window_bounds = array<i64: 1, 128>}, {pipeline_mode = #tpu.pipeline_mode<synchronous>, transform_indices = @transform_3, window_bounds = array<i64: 128, 256>}, {pipeline_mode = #tpu.pipeline_mode<synchronous>, transform_indices = @transform_4, window_bounds = array<i64: 1, 256>}, {pipeline_mode = #tpu.pipeline_mode<synchronous>, transform_indices = @transform_5, window_bounds = array<i64: 256, 384>}, {pipeline_mode = #tpu.pipeline_mode<synchronous>, transform_indices = @transform_6, window_bounds = array<i64: 1, 384>}, {transform_indices = @transform_7, window_bounds = array<i64: 16, 384>}]} {
    %c0 = arith.constant 0 : index
    %c0_0 = arith.constant 0 : index
    %0 = vector.load %arg1[%c0, %c0_0] : memref<16x32xbf16, #tpu.memory_space<vmem>>, vector<16x32xbf16>
    %c0_1 = arith.constant 0 : index
    %c0_2 = arith.constant 0 : index
    %1 = vector.load %arg2[%c0_1, %c0_2] : memref<32x128xbf16, #tpu.memory_space<vmem>>, vector<32x128xbf16>
    %cst = arith.constant dense<0.000000e+00> : vector<16x128xf32>
    %2 = tpu.matmul %0, %1, %cst {dimension_numbers = #tpu.dot_dimension_numbers<[1], [0], [0], [1], [0, 0, 1, 1], [], []>} : vector<16x32xbf16>, vector<32x128xbf16>, vector<16x128xf32> -> vector<16x128xf32>
    %c0_3 = arith.constant 0 : index
    %c0_4 = arith.constant 0 : index
    %3 = vector.load %arg3[%c0_3, %c0_4] : memref<1x128xf32, #tpu.memory_space<vmem>>, vector<1x128xf32>
    %4 = vector.broadcast %3 : vector<1x128xf32> to vector<16x128xf32>
    %5 = arith.addf %2, %4 : vector<16x128xf32>
    %cst_5 = arith.constant 0.000000e+00 : f32
    %6 = vector.broadcast %cst_5 : f32 to vector<16x128xf32>
    %7 = arith.cmpf oge, %5, %6 : vector<16x128xf32>
    %cst_6 = arith.constant 0.00999999977 : f32
    %8 = vector.broadcast %cst_6 : f32 to vector<16x128xf32>
    %9 = arith.mulf %8, %5 : vector<16x128xf32>
    %10 = arith.select %7, %5, %9 : vector<16x128xi1>, vector<16x128xf32>
    %11 = arith.truncf %10 : vector<16x128xf32> to vector<16x128xbf16>
    %c0_7 = arith.constant 0 : index
    %c0_8 = arith.constant 0 : index
    %12 = vector.load %arg4[%c0_7, %c0_8] : memref<128x256xbf16, #tpu.memory_space<vmem>>, vector<128x256xbf16>
    %cst_9 = arith.constant dense<0.000000e+00> : vector<16x256xf32>
    %13 = tpu.matmul %11, %12, %cst_9 {dimension_numbers = #tpu.dot_dimension_numbers<[1], [0], [0], [1], [0, 0, 1, 1], [], []>} : vector<16x128xbf16>, vector<128x256xbf16>, vector<16x256xf32> -> vector<16x256xf32>
    %c0_10 = arith.constant 0 : index
    %c0_11 = arith.constant 0 : index
    %14 = vector.load %arg5[%c0_10, %c0_11] : memref<1x256xf32, #tpu.memory_space<vmem>>, vector<1x256xf32>
    %15 = vector.broadcast %14 : vector<1x256xf32> to vector<16x256xf32>
    %16 = arith.addf %13, %15 : vector<16x256xf32>
    %cst_12 = arith.constant 0.000000e+00 : f32
    %17 = vector.broadcast %cst_12 : f32 to vector<16x256xf32>
    %18 = arith.cmpf oge, %16, %17 : vector<16x256xf32>
    %cst_13 = arith.constant 0.00999999977 : f32
    %19 = vector.broadcast %cst_13 : f32 to vector<16x256xf32>
    %20 = arith.mulf %19, %16 : vector<16x256xf32>
    %21 = arith.select %18, %16, %20 : vector<16x256xi1>, vector<16x256xf32>
    %22 = arith.truncf %21 : vector<16x256xf32> to vector<16x256xbf16>
    %c0_14 = arith.constant 0 : index
    %c0_15 = arith.constant 0 : index
    %23 = vector.load %arg6[%c0_14, %c0_15] : memref<256x384xbf16, #tpu.memory_space<vmem>>, vector<256x384xbf16>
    %cst_16 = arith.constant dense<0.000000e+00> : vector<16x384xf32>
    %24 = tpu.matmul %22, %23, %cst_16 {dimension_numbers = #tpu.dot_dimension_numbers<[1], [0], [0], [1], [0, 0, 1, 1], [], []>} : vector<16x256xbf16>, vector<256x384xbf16>, vector<16x384xf32> -> vector<16x384xf32>
    %c0_17 = arith.constant 0 : index
    %c0_18 = arith.constant 0 : index
    %25 = vector.load %arg7[%c0_17, %c0_18] : memref<1x384xf32, #tpu.memory_space<vmem>>, vector<1x384xf32>
    %26 = vector.broadcast %25 : vector<1x384xf32> to vector<16x384xf32>
    %27 = arith.addf %24, %26 : vector<16x384xf32>
    %cst_19 = arith.constant 0.000000e+00 : f32
    %28 = vector.broadcast %cst_19 : f32 to vector<16x384xf32>
    %29 = arith.cmpf oge, %27, %28 : vector<16x384xf32>
    %cst_20 = arith.constant 0.00999999977 : f32
    %30 = vector.broadcast %cst_20 : f32 to vector<16x384xf32>
    %31 = arith.mulf %30, %27 : vector<16x384xf32>
    %32 = arith.select %29, %27, %31 : vector<16x384xi1>, vector<16x384xf32>
    %c0_21 = arith.constant 0 : index
    %c0_22 = arith.constant 0 : index
    %33 = vector.load %arg8[%c0_21, %c0_22] : memref<16x384xf32, #tpu.memory_space<vmem>>, vector<16x384xf32>
    tpu.vector_store %arg8[%c0_21, %c0_22], %32 {strides = array<i32>} : memref<16x384xf32, #tpu.memory_space<vmem>>, vector<16x384xf32>,
    return
  }
  func.func @transform_0(%arg0: i32) -> (i32, i32) {
    %c0_i32 = arith.constant 0 : i32
    %c0_i32_0 = arith.constant 0 : i32
    return %arg0, %c0_i32 : i32, i32
  }
  func.func @transform_1(%arg0: i32) -> (i32, i32) {
    %c0_i32 = arith.constant 0 : i32
    %c0_i32_0 = arith.constant 0 : i32
    %c0_i32_1 = arith.constant 0 : i32
    return %c0_i32, %c0_i32_0 : i32, i32
  }
  func.func @transform_2(%arg0: i32) -> (i32, i32) {
    %c0_i32 = arith.constant 0 : i32
    %c0_i32_0 = arith.constant 0 : i32
    %c0_i32_1 = arith.constant 0 : i32
    return %c0_i32, %c0_i32_0 : i32, i32
  }
  func.func @transform_3(%arg0: i32) -> (i32, i32) {
    %c0_i32 = arith.constant 0 : i32
    %c0_i32_0 = arith.constant 0 : i32
    %c0_i32_1 = arith.constant 0 : i32
    return %c0_i32, %c0_i32_0 : i32, i32
  }
  func.func @transform_4(%arg0: i32) -> (i32, i32) {
    %c0_i32 = arith.constant 0 : i32
    %c0_i32_0 = arith.constant 0 : i32
    %c0_i32_1 = arith.constant 0 : i32
    return %c0_i32, %c0_i32_0 : i32, i32
  }
  func.func @transform_5(%arg0: i32) -> (i32, i32) {
    %c0_i32 = arith.constant 0 : i32
    %c0_i32_0 = arith.constant 0 : i32
    %c0_i32_1 = arith.constant 0 : i32
    return %c0_i32, %c0_i32_0 : i32, i32
  }
  func.func @transform_6(%arg0: i32) -> (i32, i32) {
    %c0_i32 = arith.constant 0 : i32
    %c0_i32_0 = arith.constant 0 : i32
    %c0_i32_1 = arith.constant 0 : i32
    return %c0_i32, %c0_i32_0 : i32, i32
  }
  func.func @transform_7(%arg0: i32) -> (i32, i32) {
    %c0_i32 = arith.constant 0 : i32
    %c0_i32_0 = arith.constant 0 : i32
    return %arg0, %c0_i32 : i32, i32
  }
}

</mosaic_0001>

<bundles_post_ra>
// kernel: tpu_custom_call.1
= control target key start
LH: loop header
LB: loop body
LE: loop exit
PB: predicated region body
PF: predicated region fallthrough
CT: control target
= control target key end

     0   :  { %12 = vsyncpa [#allocation3], 0  ;;  %s1253_s0 = inlined_call_operand.hbm [shape: bf16[16,32], index: 0, kind: input, shape index: {}]   ;;  %s1254_s1 = inlined_call_operand.hbm [shape: bf16[32,128], index: 1, kind: input, shape index: {}]   ;;  %s1255_s2 = inlined_call_operand.vmem [shape: f32[1,128], index: 2, kind: input, shape index: {}]   ;;  %s1256_s3 = inlined_call_operand.hbm [shape: bf16[128,256], index: 3, kind: input, shape index: {}]   ;;  %s1257_s4 = inlined_call_operand.vmem [shape: f32[1,256], index: 4, kind: input, shape index: {}]   ;;  %s1258_s5 = inlined_call_operand.hbm [shape: bf16[256,384], index: 5, kind: input, shape index: {}]   ;;  %s1259_s6 = inlined_call_operand.vmem [shape: f32[1,384], index: 6, kind: input, shape index: {}]   ;;  %s1260_s7 = inlined_call_operand.hbm [shape: f32[16,384], index: 7, kind: output, shape index: {}]  }
   0x1   :  { %13 = vsyncpa [#allocation6], 0 }
   0x2   :  { %14 = vsyncpa [#allocation9], 0 }
   0x3   :  { %15 = vsyncpa [#allocation4], 0  ;;  %s1121_s24 = smov [#allocation5]   ;;  %s1122_s26 = smov [#allocation2]  }
   0x4   :  { %s33_s25 = sshll.u32 %s1121_s24, 4  ;;  %s21_s27 = sshll.u32 %s1122_s26, 4  ;;  %s34_s25 = int_to_ptr.vmem [resolvable:$true] %s33_s25  ;;  %s1177_s27 = int_to_ptr.vmem [resolvable:$true] %s21_s27 }
   0x5   :  { %s1003_s30 = scalar_lea.hbm %s1254_s1, 256 }
   0x6   :  { %p1004_p0 = scmp.ne.s32.totalorder %s1254_s1, %s1003_s30  ;;  %p1007_p1 = scmp.lt.u32.totalorder %s1003_s30, %s1254_s1 }
   0x8   :  { %p1009_p2 = pnand %p1007_p1, %p1004_p0 }
   0xa   :  { %1012 = shalt.err (!%p1009_p2)
}
   0xb   :  { %s1013_s12 = scalar_lea.vmem %s34_s25, 256  ;;  %p1018_p4 = scmp.lt.s32.totalorder %s34_s25, %s34_s25 }
   0xc   :  { %p1014_p3 = scmp.ne.s32.totalorder %s34_s25, %s1013_s12  ;;  %p1019_p5 = scmp.lt.s32.totalorder %s1013_s12, %s1013_s12 }
   0xe   :  { %p1020_p6 = por %p1019_p5, %p1018_p4 }
  0x10   :  { %p1021_p7 = pnand %p1020_p6, %p1014_p3 }
  0x12   :  { %1024 = shalt.err (!%p1021_p7)
}
  0x13   :  { %s1123_s13 = smov 64   ;;  %s1124_s14 = smov 4  }
  0x14   :  { %39 = dma.hbm_to_vmem [thread:$0]  %s1254_s1, 256, %s34_s25, [#allocation6], %s1123_s13, %s1123_s13, %s1124_s14  }
  0x15   :  { %s1025_s19 = scalar_lea.hbm %s1253_s0, 128 }
  0x16   :  { %p1026_p8 = scmp.ne.s32.totalorder %s1253_s0, %s1025_s19  ;;  %p1029_p9 = scmp.lt.u32.totalorder %s1025_s19, %s1253_s0 }
  0x18   :  { %p1031_p10 = pnand %p1029_p9, %p1026_p8 }
  0x1a   :  { %1034 = shalt.err (!%p1031_p10)
}
  0x1b   :  { %s1035_s24 = scalar_lea.vmem %s1177_s27, 128  ;;  %p1040_p12 = scmp.lt.s32.totalorder %s1177_s27, %s1177_s27 }
  0x1c   :  { %p1036_p11 = scmp.ne.s32.totalorder %s1177_s27, %s1035_s24  ;;  %p1041_p13 = scmp.lt.s32.totalorder %s1035_s24, %s1035_s24 }
  0x1e   :  { %p1042_p0 = por %p1041_p13, %p1040_p12 }
  0x20   :  { %p1043_p1 = pnand %p1042_p0, %p1036_p11 }
  0x22   :  { %1046 = shalt.err (!%p1043_p1)
}
  0x23   :  { %27 = dma.hbm_to_vmem [thread:$0]  %s1253_s0, 128, %s1177_s27, [#allocation3], %s1123_s13, %s1123_s13, %s1124_s14  }
  0x24   :  { %s1125_s26 = smov [#allocation7]   ;;  %s1047_s8 = scalar_lea.hbm %s1256_s3, 2048 }
  0x25   :  { %s47_s28 = sshll.u32 %s1125_s26, 4  ;;  %p1048_p2 = scmp.ne.s32.totalorder %s1256_s3, %s1047_s8  ;;  %s48_s28 = int_to_ptr.vmem [resolvable:$true] %s47_s28 }
  0x26   :  { %p1051_p3 = scmp.lt.u32.totalorder %s1047_s8, %s1256_s3 }
  0x28   :  { %p1053_p4 = pnand %p1051_p3, %p1048_p2 }
  0x2a   :  { %1056 = shalt.err (!%p1053_p4)
}
  0x2b   :  { %s1057_s15 = scalar_lea.vmem %s48_s28, 2048  ;;  %p1062_p6 = scmp.lt.s32.totalorder %s48_s28, %s48_s28 }
  0x2c   :  { %p1058_p5 = scmp.ne.s32.totalorder %s48_s28, %s1057_s15  ;;  %p1063_p7 = scmp.lt.s32.totalorder %s1057_s15, %s1057_s15 }
  0x2e   :  { %p1064_p8 = por %p1063_p7, %p1062_p6 }
  0x30   :  { %p1065_p9 = pnand %p1064_p8, %p1058_p5 }
  0x32   :  { %1068 = shalt.err (!%p1065_p9)
}
  0x33   :  { %s1126_s0 = smov 128   ;;  %s1127_s27 = smov 8  }
  0x34   :  { %53 = dma.hbm_to_vmem [thread:$0]  %s1256_s3, 2048, %s48_s28, [#allocation6], %s1126_s0, %s1126_s0, %s1127_s27  }
  0x35   :  { %s1128_s16 = smov [#allocation8]   ;;  %s1069_s20 = scalar_lea.hbm %s1258_s5, 6144 }
  0x36   :  { %s61_s17 = sshll.u32 %s1128_s16, 4  ;;  %p1070_p10 = scmp.ne.s32.totalorder %s1258_s5, %s1069_s20  ;;  %s62_s17 = int_to_ptr.vmem [resolvable:$true] %s61_s17 }
  0x37   :  { %p1073_p11 = scmp.lt.u32.totalorder %s1069_s20, %s1258_s5 }
  0x39   :  { %p1075_p12 = pnand %p1073_p11, %p1070_p10 }
  0x3b   :  { %1078 = shalt.err (!%p1075_p12)
}
  0x3c   :  { %s1079_s1 = scalar_lea.vmem %s62_s17, 6144  ;;  %p1084_p0 = scmp.lt.s32.totalorder %s62_s17, %s62_s17 }
  0x3d   :  { %p1080_p13 = scmp.ne.s32.totalorder %s62_s17, %s1079_s1  ;;  %p1085_p1 = scmp.lt.s32.totalorder %s1079_s1, %s1079_s1 }
  0x3f   :  { %p1086_p2 = por %p1085_p1, %p1084_p0 }
  0x41   :  { %p1087_p3 = pnand %p1086_p2, %p1080_p13 }
  0x43   :  { %1090 = shalt.err (!%p1087_p3)
}
  0x44   :  { %s1129_s3 = smov 192   ;;  %s1130_s25 = smov 12  }
  0x45   :  { %67 = dma.hbm_to_vmem [thread:$0]  %s1258_s5, 6144, %s62_s17, [#allocation9], %s1129_s3, %s1129_s3, %s1130_s25  }
  0x46   :  { %1113 = dma.done.wait [#allocation3], 128  }
  0x47   :  { %1114 = vsyncadd [#allocation3], 4294967168 }
  0x48   :  { %1115 = dma.done.wait [#allocation6], 2304  }
  0x49   :  { %1116 = vsyncadd [#allocation6], 4294964992 }
  0x4a   :  { %1117 = dma.done.wait [#allocation9], 6144  }
  0x4b   :  { %1118 = vsyncadd [#allocation9], 4294961152  ;;  %v1131_v0 = vmov 0.0   ;;  %vm1132_vm0 = vmmov 0   ;;  %v912_v1 = vld [vmem:[#allocation5] sm:$0xff]   ;;  %v913_v2 = vld [vmem:[#allocation5 + $0x8] sm:$0xff]  }
  0x4c   :  { %888 = vmatprep.subr.bf16.mxu0 %v1131_v0  ;;  %892 = vmatprep.mubr.msk.bf16.mxu0 %vm1132_vm0, %v1131_v0  ;;  %v915_v3 = vld [vmem:[#allocation7 + $0x4] ss:$8 sps:$4 sm:$0xff]   ;;  %v917_v4 = vld [vmem:[#allocation7] ss:$8 sps:$4 sm:$0xff]   ;;  %v918_v6 = vld [vmem:[#allocation7 + $0x14] ss:$8 sps:$4 sm:$0xff]  }
  0x4d   :  { %889 = vmatpush3.bf16.msra.mxu0 %v912_v1  ;;  %v914_v5 = vld [vmem:[#allocation2] sm:$0xff]   ;;  %273 = vmatprep.subr.bf16.mxu1 %v915_v3  ;;  %vm113_vm1 = vcmask 261120   ;;  %v920_v7 = vld [vmem:[#allocation7 + $0x10] ss:$8 sps:$4 sm:$0xff]   ;;  %v924_v10 = vld [vmem:[#allocation7 + $0x34] ss:$8 sps:$4 sm:$0xff]  }
  0x4e   :  { %890 = vmatprep.subr.bf16.mxu0 %v1131_v0  ;;  %274 = vmatpush1.bf16.msra.mxu1 %v917_v4  ;;  %v921_v8 = vld [vmem:[#allocation7 + $0x24] ss:$8 sps:$4 sm:$0xff]   ;;  %v923_v9 = vld [vmem:[#allocation7 + $0x20] ss:$8 sps:$4 sm:$0xff]   ;;  %v926_v11 = vld [vmem:[#allocation7 + $0x30] ss:$8 sps:$4 sm:$0xff]  }
  0x4f   :  { %275 = vmatprep.subr.bf16.mxu1 %v918_v6  ;;  %v927_v12 = vld [vmem:[#allocation7 + $0x44] ss:$8 sps:$4 sm:$0xff]   ;;  %v929_v13 = vld [vmem:[#allocation7 + $0x40] ss:$8 sps:$4 sm:$0xff]   ;;  %v930_v14 = vld [vmem:[#allocation7 + $0x54] ss:$8 sps:$4 sm:$0xff]  }
  0x50   :  { %v932_v15 = vld [vmem:[#allocation7 + $0x50] ss:$8 sps:$4 sm:$0xff]   ;;  %v933_v16 = vld [vmem:[#allocation7 + $0x64] ss:$8 sps:$4 sm:$0xff]   ;;  %v935_v17 = vld [vmem:[#allocation7 + $0x60] ss:$8 sps:$4 sm:$0xff]  }
  0x51   :  { %891 = vmatpush3.bf16.msra.mxu0 %v913_v2  ;;  %v936_v18 = vld [vmem:[#allocation7 + $0x74] ss:$8 sps:$4 sm:$0xff]   ;;  %v938_v19 = vld [vmem:[#allocation7 + $0x70] ss:$8 sps:$4 sm:$0xff]   ;;  %v1133_v20 = vmov 0  }
  0x52   :  { %276 = vmatpush1.bf16.msra.mxu1 %v920_v7  ;;  %305 = vmatprep.mubr.bf16.mxu1 %v1133_v20  ;;  %v939_v21 = vld [vmem:[#allocation8] ss:$12 sps:$4 sm:$0xff]   ;;  %v941_v22 = vld [vmem:[#allocation8 + $0x4] ss:$12 sps:$4 sm:$0xff]   ;;  %v944_v23 = vld [vmem:[#allocation8 + $0x1c] ss:$12 sps:$4 sm:$0xff]  }
  0x53   :  { %277 = vmatprep.subr.bf16.mxu1 %v921_v8  ;;  %667 = vmatprep.subr.bf16.mxu0 %v941_v22  ;;  %v942_v24 = vld [vmem:[#allocation8 + $0x18] ss:$12 sps:$4 sm:$0xff]   ;;  %v947_v25 = vld [vmem:[#allocation8 + $0x34] ss:$12 sps:$4 sm:$0xff]   ;;  %v945_v27 = vld [vmem:[#allocation8 + $0x30] ss:$12 sps:$4 sm:$0xff]  }
  0x54   :  { %893 = vmatmul.mubr.msk.bf16.vlgmr.msra.gmra.mrb[0].mxu0 %vm113_vm1, %v914_v5  ;;  %v966_v26 = vld [vmem:[#allocation8 + $0xc8] ss:$12 sps:$4 sm:$0xff]   ;;  %v950_v28 = vld [vmem:[#allocation8 + $0x4c] ss:$12 sps:$4 sm:$0xff]   ;;  %v953_v30 = vld [vmem:[#allocation8 + $0x64] ss:$12 sps:$4 sm:$0xff]  }
  0x55   :  { %668 = vmatpush1.bf16.msra.mxu0 %v939_v21  ;;  %v948_v29 = vld [vmem:[#allocation8 + $0x48] ss:$12 sps:$4 sm:$0xff]   ;;  %v951_v31 = vld [vmem:[#allocation8 + $0x60] ss:$12 sps:$4 sm:$0xff]   ;;  %v954_v33 = vld [vmem:[#allocation8 + $0x78] ss:$12 sps:$4 sm:$0xff]  }
  0x56   :  { %278 = vmatpush1.bf16.msra.mxu1 %v923_v9  ;;  %669 = vmatprep.subr.bf16.mxu0 %v944_v23  ;;  %v956_v32 = vld [vmem:[#allocation8 + $0x7c] ss:$12 sps:$4 sm:$0xff]   ;;  %v959_v34 = vld [vmem:[#allocation8 + $0x94] ss:$12 sps:$4 sm:$0xff]   ;;  %v962_v36 = vld [vmem:[#allocation8 + $0xac] ss:$12 sps:$4 sm:$0xff]  }
  0x57   :  { %279 = vmatprep.subr.bf16.mxu1 %v924_v10  ;;  %v957_v35 = vld [vmem:[#allocation8 + $0x90] ss:$12 sps:$4 sm:$0xff]   ;;  %v960_v37 = vld [vmem:[#allocation8 + $0xa8] ss:$12 sps:$4 sm:$0xff]   ;;  %v963_v39 = vld [vmem:[#allocation8 + $0xc0] ss:$12 sps:$4 sm:$0xff]  }
  0x58   :  { %v965_v38 = vld [vmem:[#allocation8 + $0xc4] ss:$12 sps:$4 sm:$0xff]   ;;  %v970_v40 = vld [vmem:[#allocation8 + $0xdc] ss:$12 sps:$4 sm:$0xff]   ;;  %v975_v42 = vld [vmem:[#allocation8 + $0xf4] ss:$12 sps:$4 sm:$0xff]  }
  0x59   :  { %670 = vmatpush1.bf16.msra.mxu0 %v942_v24  ;;  %v968_v41 = vld [vmem:[#allocation8 + $0xd8] ss:$12 sps:$4 sm:$0xff]   ;;  %v973_v43 = vld [vmem:[#allocation8 + $0xf0] ss:$12 sps:$4 sm:$0xff]   ;;  %v978_v45 = vld [vmem:[#allocation8 + $0x108] ss:$12 sps:$4 sm:$0xff]  }
  0x5a   :  { %280 = vmatpush1.bf16.msra.mxu1 %v926_v11  ;;  %671 = vmatprep.subr.bf16.mxu0 %v947_v25  ;;  %v980_v44 = vld [vmem:[#allocation8 + $0x10c] ss:$12 sps:$4 sm:$0xff]   ;;  %v985_v46 = vld [vmem:[#allocation8 + $0x124] ss:$12 sps:$4 sm:$0xff]   ;;  %v794_v48 = vld [vmem:[%s1255_s2] ss:$0 sm:$0xff] }
  0x5b   :  { %281 = vmatprep.subr.bf16.mxu1 %v927_v12  ;;  %v983_v47 = vld [vmem:[#allocation8 + $0x120] ss:$12 sps:$4 sm:$0xff]   ;;  %v967_v59 = vld [vmem:[#allocation8 + $0x8] ss:$12 sps:$4 sm:$0xff]   ;;  %v976_v63 = vld [vmem:[#allocation8 + $0xf8] ss:$12 sps:$4 sm:$0xff]  }
  0x5c   :  { %v971_v61 = vld [vmem:[#allocation8 + $0xe0] ss:$12 sps:$4 sm:$0xff]   ;;  %v977_v0 = vld [vmem:[#allocation8 + $0x38] ss:$12 sps:$4 sm:$0xff]   ;;  %v981_v1 = vld [vmem:[#allocation8 + $0x110] ss:$12 sps:$4 sm:$0xff]  }
  0x5d   :  { %672 = vmatpush1.bf16.msra.mxu0 %v945_v27  ;;  %v972_v62 = vld [vmem:[#allocation8 + $0x20] ss:$12 sps:$4 sm:$0xff]   ;;  %v982_v2 = vld [vmem:[#allocation8 + $0x50] ss:$12 sps:$4 sm:$0xff]   ;;  %v986_v3 = vld [vmem:[#allocation8 + $0x128] ss:$12 sps:$4 sm:$0xff]  }
  0x5e   :  { %282 = vmatpush1.bf16.msra.mxu1 %v929_v13  ;;  %673 = vmatprep.subr.bf16.mxu0 %v950_v28  ;;  %v987_v4 = vld [vmem:[#allocation8 + $0x68] ss:$12 sps:$4 sm:$0xff]   ;;  %v991_v6 = vld [vmem:[#allocation8 + $0x140] ss:$12 sps:$4 sm:$0xff]   ;;  %v988_v7 = vld [vmem:[#allocation8 + $0x138] ss:$12 sps:$4 sm:$0xff]  }
  0x5f   :  { %283 = vmatprep.subr.bf16.mxu1 %v930_v14  ;;  %v990_v5 = vld [vmem:[#allocation8 + $0x13c] ss:$12 sps:$4 sm:$0xff]   ;;  %v992_v8 = vld [vmem:[#allocation8 + $0x80] ss:$12 sps:$4 sm:$0xff]   ;;  %v996_v10 = vld [vmem:[#allocation8 + $0x158] ss:$12 sps:$4 sm:$0xff]  }
  0x60   :  { %v995_v9 = vld [vmem:[#allocation8 + $0x154] ss:$12 sps:$4 sm:$0xff]   ;;  %v993_v11 = vld [vmem:[#allocation8 + $0x150] ss:$12 sps:$4 sm:$0xff]   ;;  %v997_v12 = vld [vmem:[#allocation8 + $0x98] ss:$12 sps:$4 sm:$0xff]  }
  0x61   :  { %674 = vmatpush1.bf16.msra.mxu0 %v948_v29  ;;  %v1000_v13 = vld [vmem:[#allocation8 + $0x16c] ss:$12 sps:$4 sm:$0xff]   ;;  %v1001_v14 = vld [vmem:[#allocation8 + $0x170] ss:$12 sps:$4 sm:$0xff]   ;;  %v181_v20 = vld [vmem:[%s1257_s4] sm:$0x3] }
  0x62   :  { %284 = vmatpush1.bf16.msra.mxu1 %v932_v15  ;;  %675 = vmatprep.subr.bf16.mxu0 %v953_v30  ;;  %v998_v15 = vld [vmem:[#allocation8 + $0x168] ss:$12 sps:$4 sm:$0xff]  }
  0x63   :  { %285 = vmatprep.subr.bf16.mxu1 %v933_v16  ;;  %v1002_v16 = vld [vmem:[#allocation8 + $0xb0] ss:$12 sps:$4 sm:$0xff]  }
  0x65   :  { %676 = vmatpush1.bf16.msra.mxu0 %v951_v31 }
  0x66   :  { %286 = vmatpush1.bf16.msra.mxu1 %v935_v17  ;;  %677 = vmatprep.subr.bf16.mxu0 %v956_v32  ;;  %v183_v17 = vlaneseq }
  0x67   :  { %287 = vmatprep.subr.bf16.mxu1 %v936_v18 }
  0x68   :  { %v184_v18 = vshrl.u32 %v183_v17, 7 }
  0x69   :  { %678 = vmatpush1.bf16.msra.mxu0 %v954_v33 }
  0x6a   :  { %288 = vmatpush1.bf16.msra.mxu1 %v938_v19  ;;  %679 = vmatprep.subr.bf16.mxu0 %v959_v34  ;;  %v185_v19 = vsub.s32 0, %v184_v18  ;;  %v189_v21 = vsub.s32 1, %v184_v18 }
  0x6b   :  { %866 = vmatprep.subr.bf16.mxu1 %v966_v26 }
  0x6c   :  { %v186_v22 = vrot.slane %v181_v20, %v185_v19  ;;  %v190_v23 = vrot.slane %v181_v20, %v189_v21 }
  0x6d   :  { %680 = vmatpush1.bf16.msra.mxu0 %v957_v35 }
  0x6e   :  { %681 = vmatprep.subr.bf16.mxu0 %v962_v36 }
  0x71   :  { %682 = vmatpush1.bf16.msra.mxu0 %v960_v37 }
  0x72   :  { %683 = vmatprep.subr.bf16.mxu0 %v965_v38 }
  0x75   :  { %684 = vmatpush1.bf16.msra.mxu0 %v963_v39 }
  0x76   :  { %685 = vmatprep.subr.bf16.mxu0 %v970_v40 }
  0x79   :  { %686 = vmatpush1.bf16.msra.mxu0 %v968_v41 }
  0x7a   :  { %687 = vmatprep.subr.bf16.mxu0 %v975_v42  ;;  %v394_v42 = vld [vmem:[%s1259_s6] sm:$0x7]  ;;  %s1134_s6 = smov [#allocation10]  }
  0x7b   :  { %s780_s9 = sshll.u32 %s1134_s6, 4  ;;  %s781_s9 = int_to_ptr.vmem [resolvable:$true] %s780_s9 }
  0x7c   :  { %s1091_s10 = scalar_lea.vmem %s781_s9, 768  ;;  %p1096_p5 = scmp.lt.s32.totalorder %s781_s9, %s781_s9 }
  0x7d   :  { %688 = vmatpush1.bf16.msra.mxu0 %v973_v43  ;;  %v406_v43 = vsub.s32 2, %v184_v18  ;;  %p1092_p4 = scmp.ne.s32.totalorder %s781_s9, %s1091_s10  ;;  %p1097_p6 = scmp.lt.s32.totalorder %s1091_s10, %s1091_s10 }
  0x7e   :  { %689 = vmatprep.subr.bf16.mxu0 %v980_v44  ;;  %v399_v44 = vrot.slane %v394_v42, %v185_v19 }
  0x7f   :  { %p1098_p7 = por %p1097_p6, %p1096_p5 }
  0x81   :  { %690 = vmatpush1.bf16.msra.mxu0 %v978_v45  ;;  %v403_v45 = vrot.slane %v394_v42, %v189_v21  ;;  %p1099_p8 = pnand %p1098_p7, %p1092_p4 }
  0x82   :  { %691 = vmatprep.subr.bf16.mxu0 %v985_v46 }
  0x85   :  { %692 = vmatpush1.bf16.msra.mxu0 %v983_v47 }
  0x86   :  { %693 = vmatprep.subr.bf16.mxu0 %v990_v5 }
  0x89   :  { %694 = vmatpush1.bf16.msra.mxu0 %v988_v7 }
  0x8a   :  { %695 = vmatprep.subr.bf16.mxu0 %v995_v9 }
  0x8d   :  { %696 = vmatpush1.bf16.msra.mxu0 %v993_v11 }
  0x8e   :  { %697 = vmatprep.subr.bf16.mxu0 %v1000_v13 }
  0x91   :  { %698 = vmatpush1.bf16.msra.mxu0 %v998_v15 }
 0x127   :  { %v151_v49 = vpop.f32.mrb[0].mxu0 }
 0x128   :  { %v152_v50 = vadd.f32 %v794_v48, %v151_v49  ;;  %v894_v51 = vpop.f32.mrb[1].mxu0 }
 0x129   :  { %v154_v52 = vpop.f32.mrb[2].mxu0 }
 0x12a   :  { %v160_v53 = vmul.f32 0.01, %v152_v50  ;;  %v155_v54 = vadd.f32 %v794_v48, %v154_v52  ;;  %v895_v55 = vpop.f32.mrb[3].mxu0  ;;  %vm158_vm2 = vcmp.ge.f32.partialorder %v152_v50, 0.0  ;;  %v407_v48 = vrot.slane %v394_v42, %v406_v43 }
 0x12c   :  { %vm159_vm3 = vcmp.ge.f32.partialorder %v155_v54, 0.0  ;;  %v161_v56 = vmul.f32 0.01, %v155_v54  ;;  %v162_v57 = vsel %vm158_vm2, %v152_v50, %v160_v53 }
 0x12e   :  { %v163_v58 = vsel %vm159_vm3, %v155_v54, %v161_v56 }
 0x12f   :  { %v164_v60 = vpack.c.bf16 %v163_v58, %v162_v57 }
 0x131   :  { %306 = vmatmul.mubr.bf16.vlgmr.msra.gmra.mrb[0].mxu1 %v164_v60 }
 0x132   :  { %867 = vmatpush3.bf16.msra.mxu1 %v967_v59 }
 0x133   :  { %868 = vmatprep.subr.bf16.mxu1 %v971_v61 }
 0x136   :  { %869 = vmatpush3.bf16.msra.mxu1 %v972_v62 }
 0x137   :  { %870 = vmatprep.subr.bf16.mxu1 %v976_v63 }
 0x13a   :  { %871 = vmatpush3.bf16.msra.mxu1 %v977_v0 }
 0x13b   :  { %872 = vmatprep.subr.bf16.mxu1 %v981_v1 }
 0x13e   :  { %873 = vmatpush3.bf16.msra.mxu1 %v982_v2 }
 0x13f   :  { %874 = vmatprep.subr.bf16.mxu1 %v986_v3 }
 0x142   :  { %875 = vmatpush3.bf16.msra.mxu1 %v987_v4 }
 0x143   :  { %876 = vmatprep.subr.bf16.mxu1 %v991_v6 }
 0x146   :  { %877 = vmatpush3.bf16.msra.mxu1 %v992_v8 }
 0x147   :  { %878 = vmatprep.subr.bf16.mxu1 %v996_v10 }
 0x14a   :  { %879 = vmatpush3.bf16.msra.mxu1 %v997_v12 }
 0x14b   :  { %880 = vmatprep.subr.bf16.mxu1 %v1001_v14 }
 0x14e   :  { %881 = vmatpush3.bf16.msra.mxu1 %v1002_v16 }
 0x204   :  { %v307_v24 = vpop.f32.mrb[0].mxu1 }
 0x205   :  { %v308_v25 = vadd.f32 %v307_v24, %v186_v22  ;;  %v309_v26 = vpop.f32.mrb[1].mxu1 }
 0x206   :  { %v310_v27 = vadd.f32 %v309_v26, %v190_v23  ;;  %v311_v28 = vpop.f32.mrb[2].mxu1 }
 0x207   :  { %v320_v29 = vmul.f32 0.01, %v308_v25  ;;  %v312_v30 = vadd.f32 %v311_v28, %v186_v22  ;;  %v313_v31 = vpop.f32.mrb[3].mxu1  ;;  %vm316_vm4 = vcmp.ge.f32.partialorder %v308_v25, 0.0 }
 0x208   :  { %v321_v32 = vmul.f32 0.01, %v310_v27  ;;  %v314_v33 = vadd.f32 %v313_v31, %v190_v23  ;;  %vm317_vm5 = vcmp.ge.f32.partialorder %v310_v27, 0.0 }
 0x209   :  { %vm318_vm6 = vcmp.ge.f32.partialorder %v312_v30, 0.0  ;;  %v322_v34 = vmul.f32 0.01, %v312_v30  ;;  %v324_v36 = vsel %vm316_vm4, %v308_v25, %v320_v29 }
 0x20a   :  { %vm319_vm7 = vcmp.ge.f32.partialorder %v314_v33, 0.0  ;;  %v323_v35 = vmul.f32 0.01, %v314_v33  ;;  %v325_v39 = vsel %vm317_vm5, %v310_v27, %v321_v32 }
 0x20b   :  { %v326_v37 = vsel %vm318_vm6, %v312_v30, %v322_v34 }
 0x20c   :  { %v328_v38 = vpack.c.bf16 %v326_v37, %v324_v36  ;;  %v327_v40 = vsel %vm319_vm7, %v314_v33, %v323_v35 }
 0x20d   :  { %v329_v41 = vpack.c.bf16 %v327_v40, %v325_v39 }
 0x20f   :  { %699 = vmatprep.mubr.bf16.mxu0 %v329_v41  ;;  %742 = vmatprep.mubr.bf16.mxu1 %v329_v41 }
 0x210   :  { %700 = vmatmul.mubr.bf16.vlgmr.msra.gmra.mrb[4].mxu0 %v328_v38  ;;  %743 = vmatmul.mubr.bf16.vlgmr.msra.gmra.mrb[4].mxu1 %v328_v38 }
 0x2e3   :  { %v701_v46 = vpop.f32.mrb[4].mxu0  ;;  %v882_v47 = vpop.f32.mrb[4].mxu1 }
 0x2e4   :  { %v702_v49 = vadd.f32 %v701_v46, %v399_v44  ;;  %v703_v50 = vpop.f32.mrb[5].mxu0  ;;  %v883_v51 = vpop.f32.mrb[5].mxu1 }
 0x2e5   :  { %v704_v52 = vadd.f32 %v703_v50, %v403_v45  ;;  %v884_v53 = vadd.f32 %v883_v51, %v882_v47  ;;  %v705_v54 = vpop.f32.mrb[6].mxu0  ;;  %v885_v55 = vpop.f32.mrb[6].mxu1 }
 0x2e6   :  { %vm751_vm8 = vcmp.ge.f32.partialorder %v702_v49, 0.0  ;;  %v757_v56 = vmul.f32 0.01, %v702_v49  ;;  %v706_v57 = vadd.f32 %v705_v54, %v399_v44  ;;  %v707_v58 = vpop.f32.mrb[7].mxu0  ;;  %v886_v59 = vpop.f32.mrb[7].mxu1 }
 0x2e7   :  { %vm752_vm9 = vcmp.ge.f32.partialorder %v704_v52, 0.0  ;;  %v758_v60 = vmul.f32 0.01, %v704_v52  ;;  %v745_v61 = vadd.f32 %v884_v53, %v407_v48  ;;  %v708_v62 = vadd.f32 %v707_v58, %v403_v45 }
 0x2e8   :  { %v763_v63 = vsel %vm751_vm8, %v702_v49, %v757_v56  ;;  %vm754_vm10 = vcmp.ge.f32.partialorder %v706_v57, 0.0  ;;  %v760_v0 = vmul.f32 0.01, %v706_v57  ;;  %v887_v1 = vadd.f32 %v886_v59, %v885_v55 }
 0x2e9   :  { %769 = vst [vmem:[#allocation10] sm:$0xff] %v763_v63  ;;  %v764_v2 = vsel %vm752_vm9, %v704_v52, %v758_v60  ;;  %vm753_vm11 = vcmp.ge.f32.partialorder %v745_v61, 0.0  ;;  %v759_v3 = vmul.f32 0.01, %v745_v61  ;;  %vm755_vm12 = vcmp.ge.f32.partialorder %v708_v62, 0.0 }
 0x2ea   :  { %770 = vst [vmem:[#allocation10 + $0x8] sm:$0xff] %v764_v2  ;;  %v766_v4 = vsel %vm754_vm10, %v706_v57, %v760_v0  ;;  %v761_v5 = vmul.f32 0.01, %v708_v62  ;;  %v748_v6 = vadd.f32 %v887_v1, %v407_v48 }
 0x2eb   :  { %v765_v7 = vsel %vm753_vm11, %v745_v61, %v759_v3  ;;  %772 = vst [vmem:[#allocation10 + $0x18] sm:$0xff] %v766_v4 }
 0x2ec   :  { %771 = vst [vmem:[#allocation10 + $0x10] sm:$0xff] %v765_v7  ;;  %v767_v8 = vsel %vm755_vm12, %v708_v62, %v761_v5  ;;  %vm756_vm13 = vcmp.ge.f32.partialorder %v748_v6, 0.0  ;;  %v762_v9 = vmul.f32 0.01, %v748_v6 }
 0x2ed   :  { %773 = vst [vmem:[#allocation10 + $0x20] sm:$0xff] %v767_v8 }
 0x2ee   :  { %v768_v10 = vsel %vm756_vm13, %v748_v6, %v762_v9 }
 0x2ef   :  { %774 = vst [vmem:[#allocation10 + $0x28] sm:$0xff] %v768_v10 }
 0x2f0   :  { %1102 = shalt.err (!%p1099_p8)
}
 0x2f1   :  { %s1103_s15 = scalar_lea.hbm %s1260_s7, 768 }
 0x2f2   :  { %p1104_p9 = scmp.ne.s32.totalorder %s1260_s7, %s1103_s15  ;;  %p1107_p10 = scmp.lt.u32.totalorder %s1103_s15, %s1260_s7 }
 0x2f4   :  { %p1109_p11 = pnand %p1107_p10, %p1104_p9 }
 0x2f6   :  { %1112 = shalt.err (!%p1109_p11)
}
 0x2f7   :  { %s1135_s16 = smov 384   ;;  %s1136_s17 = smov 24  }
 0x2f8   :  { %786 = dma.vmem_to_hbm [thread:$0]  %s781_s9, 768, %s1260_s7, [#allocation4], %s1135_s16, %s1135_s16, %s1136_s17  }
 0x2f9   :  { %1119 = dma.done.wait [#allocation4], 768  }
 0x2fa   :  { %1120 = vsyncadd [#allocation4], 4294966528 }
 0x2fb   :  { %790 = vsyncpa [#allocation3], 1 }
 0x2fc   :  { %791 = vsyncpa [#allocation6], 1 }
 0x2fd   :  { %792 = vsyncpa [#allocation9], 1 }
 0x2fe   :  { %793 = vsyncpa [#allocation4], 1 }

</bundles_post_ra>
